<compile_context>
chip_gen: v6e
topology: v6e:2x2x1
jax: 0.10.0
libtpu: 0.0.40
codegen_flags: <defaults>
</compile_context>

<pallas_src>
import jax
import jax.numpy as jnp
from jax import lax
from jax.experimental import pallas as pl
from jax.experimental.pallas import tpu as pltpu

BN_EPS = 1e-5          # PyTorch BatchNorm3d default
_MIB = 1024 * 1024


def _round_up(x, m):
    return ((x + m - 1) // m) * m


# --------------- conv (3 depth-tap matmuls) + BN partial stats ----------------
def _conv_stats_kernel(p0_ref, p1_ref, p2_ref, w_ref, y_ref, sum_ref, ssq_ref):
    # p*_ref: (1, HW8, K9P) depth-shifted patch views; w_ref: (3, K9P, Cout)
    y = jnp.dot(p0_ref[0], w_ref[0], preferred_element_type=jnp.float32)
    y = y + jnp.dot(p1_ref[0], w_ref[1], preferred_element_type=jnp.float32)
    y = y + jnp.dot(p2_ref[0], w_ref[2], preferred_element_type=jnp.float32)
    y_ref[0] = y.astype(y_ref.dtype)
    # BN partials in f32 from the un-cast accumulator; zero-padded rows add 0.
    sum_ref[0] = jnp.sum(y, axis=0, keepdims=True)          # (1, Cout)
    ssq_ref[0] = jnp.sum(y * y, axis=0, keepdims=True)      # (1, Cout)


# ------------------------- BN apply: fused multiply-add -----------------------
def _bn_apply_kernel(y_ref, scale_ref, shift_ref, o_ref):
    o_ref[...] = (y_ref[...].astype(jnp.float32) * scale_ref[...]
                  + shift_ref[...])


# --------------------------------- wrapper ------------------------------------
def same_block3d(x, w, b, gamma, beta, *, mxu_dtype=jnp.bfloat16,
                 bn_block_bytes=16 * _MIB):
    """x: (N, C_in, D, H, W) f32 -> (N, C_out, D, H, W) f32 (train-mode BN)."""
    del b  # conv bias is exactly cancelled by train-mode BN mean subtraction
    N, Cin, D, H, W = x.shape
    Cout, Cin_w, K, _, _ = w.shape
    assert Cin_w == Cin, "groups != 1 not supported"
    assert K == 3, "kernel_size != 3 not supported"
    HW = H * W
    HW8 = _round_up(HW, 8)                 # sublane-align each depth slice
    K9 = K * K * Cin                       # contraction per depth tap
    K9P = _round_up(K9, 128)               # zero-padded, MXU-aligned contraction
    ND = N * D
    ROWS = N * D * HW                      # true element count for BN stats
    itemsize = jnp.dtype(mxu_dtype).itemsize
    y_dtype = mxu_dtype                    # conv_out storage dtype (bf16 default)

    # ---- wrapper glue: channels-last, zero pad, im2col over (kh,kw) only -----
    xl = jnp.transpose(x, (0, 2, 3, 4, 1))                         # (N,D,H,W,Cin)
    xp = jnp.pad(xl, ((0, 0), (1, 1), (1, 1), (1, 1), (0, 0)))     # (N,D+2,H+2,W+2,C)
    taps = [xp[:, :, kh:kh + H, kw:kw + W, :]
            for kh in range(K) for kw in range(K)]
    p9 = jnp.concatenate(taps, axis=-1).reshape(N, D + 2, HW, K9)
    p9 = jnp.pad(p9, ((0, 0), (0, 0), (0, HW8 - HW), (0, K9P - K9)))
    patches = p9.reshape(N * (D + 2), HW8, K9P).astype(mxu_dtype)

    # weights: (Cout,Cin,3,3,3) -> (kd, kh*kw*Cin, Cout), zero-pad contraction
    w2 = jnp.transpose(w, (2, 3, 4, 1, 0)).reshape(K, K9, Cout)
    w2 = jnp.pad(w2, ((0, 0), (0, K9P - K9), (0, 0))).astype(mxu_dtype)

    # ---- pass 1: conv + per-(n,d) BN partial sums ----------------------------
    def lhs_spec(kd):
        return pl.BlockSpec((1, HW8, K9P),
                            lambda n, d, kd=kd: (n * (D + 2) + d + kd, 0, 0))

    y_bytes = jnp.dtype(y_dtype).itemsize
    conv_step_bytes = (2 * 3 * HW8 * K9P * itemsize       # 3 lhs blocks, 2-buf
                       + 2 * 3 * K9P * Cout * itemsize    # weights (resident)
                       + 2 * HW8 * Cout * y_bytes         # conv_out block
                       + 4 * Cout * 4)                    # stats
    conv_vmem = int(min(64 * _MIB, max(32 * _MIB, 2 * conv_step_bytes)))

    conv_cost = pl.CostEstimate(
        flops=2 * ND * HW8 * 3 * K9P * Cout,
        transcendentals=0,
        bytes_accessed=(3 * ND * HW8 * K9P * itemsize     # patches read 3x
                        + K * K9P * Cout * itemsize       # weights
                        + ND * HW8 * Cout * y_bytes       # conv_out write
                        + 2 * ND * Cout * 4),             # partial stats
    )

    conv_out, psum, pssq = pl.pallas_call(
        _conv_stats_kernel,
        out_shape=(
            jax.ShapeDtypeStruct((ND, HW8, Cout), y_dtype),
            jax.ShapeDtypeStruct((ND, 1, Cout), jnp.float32),
            jax.ShapeDtypeStruct((ND, 1, Cout), jnp.float32),
        ),
        grid_spec=pltpu.PrefetchScalarGridSpec(
            num_scalar_prefetch=0,
            grid=(N, D),
            in_specs=[
                lhs_spec(0), lhs_spec(1), lhs_spec(2),
                pl.BlockSpec((K, K9P, Cout), lambda n, d: (0, 0, 0)),
            ],
            out_specs=[
                pl.BlockSpec((1, HW8, Cout), lambda n, d: (n * D + d, 0, 0)),
                pl.BlockSpec((1, 1, Cout), lambda n, d: (n * D + d, 0, 0)),
                pl.BlockSpec((1, 1, Cout), lambda n, d: (n * D + d, 0, 0)),
            ],
        ),
        compiler_params=pltpu.CompilerParams(
            dimension_semantics=("parallel", "parallel"),
            vmem_limit_bytes=conv_vmem,
        ),
        cost_estimate=conv_cost,
    )(patches, patches, patches, w2)

    # ---- combine per-(n,d) partials -> per-channel scale / shift (tiny) ------
    # TODO(synk): E[y^2]-E[y]^2 can cancel at extreme scales; a shifted/two-pass
    # variance would be safer if production stats get large.
    total = jnp.float32(ROWS)                 # true rows; padded rows are zero
    mean = jnp.sum(psum, axis=(0, 1)) / total
    var = jnp.sum(pssq, axis=(0, 1)) / total - mean * mean   # biased (BN fwd)
    inv = lax.rsqrt(var + BN_EPS)
    g32 = gamma.astype(jnp.float32)
    scale = (g32 * inv).reshape(1, 1, Cout)
    shift = (beta.astype(jnp.float32) - g32 * inv * mean).reshape(1, 1, Cout)

    # ---- pass 2: BN apply (mem-bound; pack many depth slices per step) -------
    elem_bytes = y_bytes + 4                  # read conv_out + write f32 out
    bd = 1
    for c in range(1, ND + 1):
        if ND % c == 0 and 2 * c * HW8 * Cout * elem_bytes <= bn_block_bytes:
            bd = c
    bn_vmem = int(min(64 * _MIB,
                      max(32 * _MIB, 3 * bd * HW8 * Cout * elem_bytes)))

    out3 = pl.pallas_call(
        _bn_apply_kernel,
        out_shape=jax.ShapeDtypeStruct((ND, HW8, Cout), jnp.float32),
        grid_spec=pltpu.PrefetchScalarGridSpec(
            num_scalar_prefetch=0,
            grid=(ND // bd,),
            in_specs=[
                pl.BlockSpec((bd, HW8, Cout), lambda i: (i, 0, 0)),
                pl.BlockSpec((1, 1, Cout), lambda i: (0, 0, 0)),
                pl.BlockSpec((1, 1, Cout), lambda i: (0, 0, 0)),
            ],
            out_specs=pl.BlockSpec((bd, HW8, Cout), lambda i: (i, 0, 0)),
        ),
        compiler_params=pltpu.CompilerParams(
            dimension_semantics=("parallel",),
            vmem_limit_bytes=bn_vmem,
        ),
    )(conv_out, scale, shift)

    out = out3.reshape(N, D, HW8, Cout)[:, :, :HW, :].reshape(N, D, H, W, Cout)
    return jnp.transpose(out, (0, 4, 1, 2, 3))     # back to NCDHW


# ------------------------------ pure-JAX reference ----------------------------
def same_block3d_ref(x, w, b, gamma, beta):
    y = lax.conv_general_dilated(
        x, w, window_strides=(1, 1, 1),
        padding=((1, 1), (1, 1), (1, 1)),
        dimension_numbers=("NCDHW", "OIDHW", "NCDHW"),
    ) + b.reshape(1, -1, 1, 1, 1)
    mean = jnp.mean(y, axis=(0, 2, 3, 4), keepdims=True)
    var = jnp.mean((y - mean) ** 2, axis=(0, 2, 3, 4), keepdims=True)
    return (y - mean) * lax.rsqrt(var + BN_EPS) * gamma.reshape(1, -1, 1, 1, 1) \
        + beta.reshape(1, -1, 1, 1, 1)


if __name__ == "__main__":
    key = jax.random.PRNGKey(0)
    k_x, k_w, k_b, k_g, k_be = jax.random.split(key, 5)

    # Small shapes: N*D = 8 grid steps, HW 36 -> 40 (row padding), K9 36 -> 128
    # (contraction padding), Cout = 8 kept un-padded in the outputs.
    N, C_IN, C_OUT, D, H, W = 2, 4, 8, 4, 6, 6
    x = jax.random.normal(k_x, (N, C_IN, D, H, W), dtype=jnp.float32)
    w = 0.1 * jax.random.normal(k_w, (C_OUT, C_IN, 3, 3, 3), dtype=jnp.float32)
    b = 0.1 * jax.random.normal(k_b, (C_OUT,), dtype=jnp.float32)
    gamma = 1.0 + 0.1 * jax.random.normal(k_g, (C_OUT,), dtype=jnp.float32)
    beta = 0.1 * jax.random.normal(k_be, (C_OUT,), dtype=jnp.float32)

    ref = jax.block_until_ready(same_block3d_ref(x, w, b, gamma, beta))

    # Default path: bf16 MXU inputs + bf16 conv_out intermediate (v6e/v7x).
    out_bf = jax.block_until_ready(same_block3d(x, w, b, gamma, beta))
    assert out_bf.shape == (N, C_OUT, D, H, W), out_bf.shape
    assert jnp.allclose(out_bf, ref, atol=5e-2, rtol=5e-2), \
        float(jnp.max(jnp.abs(out_bf - ref)))

    # f32 MXU + f32 intermediate path (tight check, v5e-safe).
    out_f32 = jax.block_until_ready(
        same_block3d(x, w, b, gamma, beta, mxu_dtype=jnp.float32))
    assert jnp.allclose(out_f32, ref, atol=2e-3, rtol=2e-3), \
        float(jnp.max(jnp.abs(out_f32 - ref)))

    print("KERNEL_OK")
</pallas_src>

<mosaic_0001>
module attributes {stable_mosaic.version = 11 : i64} {
  func.func @_conv_stats_kernel(%arg0: i32, %arg1: i32, %arg2: memref<1x40x128xbf16, #tpu.memory_space<vmem>>, %arg3: memref<1x40x128xbf16, #tpu.memory_space<vmem>>, %arg4: memref<1x40x128xbf16, #tpu.memory_space<vmem>>, %arg5: memref<3x128x8xbf16, #tpu.memory_space<vmem>>, %arg6: memref<1x40x8xbf16, #tpu.memory_space<vmem>>, %arg7: memref<1x1x8xf32, #tpu.memory_space<vmem>>, %arg8: memref<1x1x8xf32, #tpu.memory_space<vmem>>) attributes {dimension_semantics = [#tpu.dimension_semantics<parallel>, #tpu.dimension_semantics<parallel>], iteration_bounds = array<i64: 2, 4>, scalar_prefetch = 0 : i64, scratch_operands = 0 : i64, tpu.core_type = #tpu.core_type<tc>, window_params = [{transform_indices = @transform_0, window_bounds = array<i64: 1, 40, 128>}, {transform_indices = @transform_1, window_bounds = array<i64: 1, 40, 128>}, {transform_indices = @transform_2, window_bounds = array<i64: 1, 40, 128>}, {pipeline_mode = #tpu.pipeline_mode<synchronous>, transform_indices = @transform_3, window_bounds = array<i64: 3, 128, 8>}, {transform_indices = @transform_4, window_bounds = array<i64: 1, 40, 8>}, {transform_indices = @transform_5, window_bounds = array<i64: 1, 1, 8>}, {transform_indices = @transform_6, window_bounds = array<i64: 1, 1, 8>}]} {
    %c0 = arith.constant 0 : index
    %c0_0 = arith.constant 0 : index
    %c0_1 = arith.constant 0 : index
    %0 = vector.load %arg2[%c0, %c0_0, %c0_1] : memref<1x40x128xbf16, #tpu.memory_space<vmem>>, vector<1x40x128xbf16>
    %1 = vector.shape_cast %0 : vector<1x40x128xbf16> to vector<40x128xbf16>
    %c0_2 = arith.constant 0 : index
    %c0_3 = arith.constant 0 : index
    %c0_4 = arith.constant 0 : index
    %2 = vector.load %arg5[%c0_2, %c0_3, %c0_4] : memref<3x128x8xbf16, #tpu.memory_space<vmem>>, vector<1x128x8xbf16>
    %3 = vector.shape_cast %2 : vector<1x128x8xbf16> to vector<128x8xbf16>
    %cst = arith.constant dense<0.000000e+00> : vector<40x8xf32>
    %4 = tpu.matmul %1, %3, %cst {dimension_numbers = #tpu.dot_dimension_numbers<[1], [0], [0], [1], [0, 0, 1, 1], [], []>} : vector<40x128xbf16>, vector<128x8xbf16>, vector<40x8xf32> -> vector<40x8xf32>
    %c0_5 = arith.constant 0 : index
    %c0_6 = arith.constant 0 : index
    %c0_7 = arith.constant 0 : index
    %5 = vector.load %arg3[%c0_5, %c0_6, %c0_7] : memref<1x40x128xbf16, #tpu.memory_space<vmem>>, vector<1x40x128xbf16>
    %6 = vector.shape_cast %5 : vector<1x40x128xbf16> to vector<40x128xbf16>
    %c1 = arith.constant 1 : index
    %c0_8 = arith.constant 0 : index
    %c0_9 = arith.constant 0 : index
    %7 = vector.load %arg5[%c1, %c0_8, %c0_9] : memref<3x128x8xbf16, #tpu.memory_space<vmem>>, vector<1x128x8xbf16>
    %8 = vector.shape_cast %7 : vector<1x128x8xbf16> to vector<128x8xbf16>
    %cst_10 = arith.constant dense<0.000000e+00> : vector<40x8xf32>
    %9 = tpu.matmul %6, %8, %cst_10 {dimension_numbers = #tpu.dot_dimension_numbers<[1], [0], [0], [1], [0, 0, 1, 1], [], []>} : vector<40x128xbf16>, vector<128x8xbf16>, vector<40x8xf32> -> vector<40x8xf32>
    %10 = arith.addf %4, %9 : vector<40x8xf32>
    %c0_11 = arith.constant 0 : index
    %c0_12 = arith.constant 0 : index
    %c0_13 = arith.constant 0 : index
    %11 = vector.load %arg4[%c0_11, %c0_12, %c0_13] : memref<1x40x128xbf16, #tpu.memory_space<vmem>>, vector<1x40x128xbf16>
    %12 = vector.shape_cast %11 : vector<1x40x128xbf16> to vector<40x128xbf16>
    %c2 = arith.constant 2 : index
    %c0_14 = arith.constant 0 : index
    %c0_15 = arith.constant 0 : index
    %13 = vector.load %arg5[%c2, %c0_14, %c0_15] : memref<3x128x8xbf16, #tpu.memory_space<vmem>>, vector<1x128x8xbf16>
    %14 = vector.shape_cast %13 : vector<1x128x8xbf16> to vector<128x8xbf16>
    %cst_16 = arith.constant dense<0.000000e+00> : vector<40x8xf32>
    %15 = tpu.matmul %12, %14, %cst_16 {dimension_numbers = #tpu.dot_dimension_numbers<[1], [0], [0], [1], [0, 0, 1, 1], [], []>} : vector<40x128xbf16>, vector<128x8xbf16>, vector<40x8xf32> -> vector<40x8xf32>
    %16 = arith.addf %10, %15 : vector<40x8xf32>
    %17 = arith.truncf %16 : vector<40x8xf32> to vector<40x8xbf16>
    %c0_17 = arith.constant 0 : index
    %c0_18 = arith.constant 0 : index
    %c0_19 = arith.constant 0 : index
    %18 = vector.load %arg6[%c0_17, %c0_18, %c0_19] : memref<1x40x8xbf16, #tpu.memory_space<vmem>>, vector<1x40x8xbf16>
    %19 = vector.shape_cast %18 : vector<1x40x8xbf16> to vector<40x8xbf16>
    %20 = vector.shape_cast %17 : vector<40x8xbf16> to vector<1x40x8xbf16>
    tpu.vector_store %arg6[%c0_17, %c0_18, %c0_19], %20 {strides = array<i32>} : memref<1x40x8xbf16, #tpu.memory_space<vmem>>, vector<1x40x8xbf16>,
    %cst_20 = arith.constant dense<0.000000e+00> : vector<8xf32>
    %21 = vector.multi_reduction <add>, %16, %cst_20 [0] : vector<40x8xf32> to vector<8xf32>
    %22 = vector.shape_cast %21 : vector<8xf32> to vector<1x8xf32>
    %c0_21 = arith.constant 0 : index
    %c0_22 = arith.constant 0 : index
    %c0_23 = arith.constant 0 : index
    %23 = vector.load %arg7[%c0_21, %c0_22, %c0_23] : memref<1x1x8xf32, #tpu.memory_space<vmem>>, vector<1x1x8xf32>
    %24 = vector.shape_cast %23 : vector<1x1x8xf32> to vector<1x8xf32>
    %25 = vector.shape_cast %22 : vector<1x8xf32> to vector<1x1x8xf32>
    tpu.vector_store %arg7[%c0_21, %c0_22, %c0_23], %25 {strides = array<i32>} : memref<1x1x8xf32, #tpu.memory_space<vmem>>, vector<1x1x8xf32>,
    %26 = arith.mulf %16, %16 : vector<40x8xf32>
    %cst_24 = arith.constant dense<0.000000e+00> : vector<8xf32>
    %27 = vector.multi_reduction <add>, %26, %cst_24 [0] : vector<40x8xf32> to vector<8xf32>
    %28 = vector.shape_cast %27 : vector<8xf32> to vector<1x8xf32>
    %c0_25 = arith.constant 0 : index
    %c0_26 = arith.constant 0 : index
    %c0_27 = arith.constant 0 : index
    %29 = vector.load %arg8[%c0_25, %c0_26, %c0_27] : memref<1x1x8xf32, #tpu.memory_space<vmem>>, vector<1x1x8xf32>
    %30 = vector.shape_cast %29 : vector<1x1x8xf32> to vector<1x8xf32>
    %31 = vector.shape_cast %28 : vector<1x8xf32> to vector<1x1x8xf32>
    tpu.vector_store %arg8[%c0_25, %c0_26, %c0_27], %31 {strides = array<i32>} : memref<1x1x8xf32, #tpu.memory_space<vmem>>, vector<1x1x8xf32>,
    return
  }
  func.func @transform_0(%arg0: i32, %arg1: i32) -> (i32, i32, i32) {
    %c6_i32 = arith.constant 6 : i32
    %0 = arith.muli %arg0, %c6_i32 : i32
    %1 = arith.addi %0, %arg1 : i32
    %c0_i32 = arith.constant 0 : i32
    %2 = arith.addi %1, %c0_i32 : i32
    %c0_i32_0 = arith.constant 0 : i32
    %c0_i32_1 = arith.constant 0 : i32
    %c0_i32_2 = arith.constant 0 : i32
    return %2, %c0_i32_0, %c0_i32_1 : i32, i32, i32
  }
  func.func @transform_1(%arg0: i32, %arg1: i32) -> (i32, i32, i32) {
    %c6_i32 = arith.constant 6 : i32
    %0 = arith.muli %arg0, %c6_i32 : i32
    %1 = arith.addi %0, %arg1 : i32
    %c1_i32 = arith.constant 1 : i32
    %2 = arith.addi %1, %c1_i32 : i32
    %c0_i32 = arith.constant 0 : i32
    %c0_i32_0 = arith.constant 0 : i32
    %c0_i32_1 = arith.constant 0 : i32
    return %2, %c0_i32, %c0_i32_0 : i32, i32, i32
  }
  func.func @transform_2(%arg0: i32, %arg1: i32) -> (i32, i32, i32) {
    %c6_i32 = arith.constant 6 : i32
    %0 = arith.muli %arg0, %c6_i32 : i32
    %1 = arith.addi %0, %arg1 : i32
    %c2_i32 = arith.constant 2 : i32
    %2 = arith.addi %1, %c2_i32 : i32
    %c0_i32 = arith.constant 0 : i32
    %c0_i32_0 = arith.constant 0 : i32
    %c0_i32_1 = arith.constant 0 : i32
    return %2, %c0_i32, %c0_i32_0 : i32, i32, i32
  }
  func.func @transform_3(%arg0: i32, %arg1: i32) -> (i32, i32, i32) {
    %c0_i32 = arith.constant 0 : i32
    %c0_i32_0 = arith.constant 0 : i32
    %c0_i32_1 = arith.constant 0 : i32
    %c0_i32_2 = arith.constant 0 : i32
    return %c0_i32, %c0_i32_0, %c0_i32_1 : i32, i32, i32
  }
  func.func @transform_4(%arg0: i32, %arg1: i32) -> (i32, i32, i32) {
    %c4_i32 = arith.constant 4 : i32
    %0 = arith.muli %arg0, %c4_i32 : i32
    %1 = arith.addi %0, %arg1 : i32
    %c0_i32 = arith.constant 0 : i32
    %c0_i32_0 = arith.constant 0 : i32
    %c0_i32_1 = arith.constant 0 : i32
    return %1, %c0_i32, %c0_i32_0 : i32, i32, i32
  }
  func.func @transform_5(%arg0: i32, %arg1: i32) -> (i32, i32, i32) {
    %c4_i32 = arith.constant 4 : i32
    %0 = arith.muli %arg0, %c4_i32 : i32
    %1 = arith.addi %0, %arg1 : i32
    %c0_i32 = arith.constant 0 : i32
    %c0_i32_0 = arith.constant 0 : i32
    %c0_i32_1 = arith.constant 0 : i32
    return %1, %c0_i32, %c0_i32_0 : i32, i32, i32
  }
  func.func @transform_6(%arg0: i32, %arg1: i32) -> (i32, i32, i32) {
    %c4_i32 = arith.constant 4 : i32
    %0 = arith.muli %arg0, %c4_i32 : i32
    %1 = arith.addi %0, %arg1 : i32
    %c0_i32 = arith.constant 0 : i32
    %c0_i32_0 = arith.constant 0 : i32
    %c0_i32_1 = arith.constant 0 : i32
    return %1, %c0_i32, %c0_i32_0 : i32, i32, i32
  }
}

</mosaic_0001>

<bundles_post_ra>
// kernel: tpu_custom_call.1
= control target key start
LH: loop header
LB: loop body
LE: loop exit
PB: predicated region body
PF: predicated region fallthrough
CT: control target
= control target key end

     0   :  { %s2520_s0 = inlined_call_operand.hbm [shape: bf16[12,40,128], index: 0, kind: input, shape index: {}]   ;;  %s2521_s1 = inlined_call_operand.hbm [shape: bf16[12,40,128], index: 1, kind: input, shape index: {}]   ;;  %s2522_s2 = inlined_call_operand.hbm [shape: bf16[12,40,128], index: 2, kind: input, shape index: {}]   ;;  %s2523_s3 = inlined_call_operand.vmem [shape: bf16[3,128,8], index: 3, kind: input, shape index: {}]   ;;  %s2524_s4 = inlined_call_operand.vmem [shape: bf16[8,40,8], index: 4, kind: output, shape index: {0}]   ;;  %s2525_s5 = inlined_call_operand.hbm [shape: f32[8,1,8], index: 5, kind: output, shape index: {1}]   ;;  %s2526_s6 = inlined_call_operand.hbm [shape: f32[8,1,8], index: 6, kind: output, shape index: {2}]  }
   0x1   :  { %2546 = sst [smem:[#allocation29_spill]] %s2520_s0 }
   0x2   :  { %2547 = sst [smem:[#allocation30_spill]] %s2521_s1 }
   0x3   :  { %2548 = sst [smem:[#allocation31_spill]] %s2522_s2 }
   0x4   :  { %2549 = sst [smem:[#allocation32_spill]] %s2523_s3 }
   0x5   :  { %2550 = sst [smem:[#allocation33_spill]] %s2524_s4 }
   0x6   :  { %2551 = sst [smem:[#allocation34_spill]] %s2525_s5 }
   0x7   :  { %2552 = sst [smem:[#allocation35_spill]] %s2526_s6 }
   0x8   :  { %12 = vsyncpa [#allocation3], 0 }
   0x9   :  { %14 = vsyncpa [#allocation3 + $0x1], 0 }
   0xa   :  { %15 = vsyncpa [#allocation6], 0 }
   0xb   :  { %17 = vsyncpa [#allocation6 + $0x1], 0 }
   0xc   :  { %18 = vsyncpa [#allocation4], 0 }
   0xd   :  { %20 = vsyncpa [#allocation4 + $0x1], 0 }
   0xe   :  { %21 = vsyncpa [#allocation10], 0 }
   0xf   :  { %23 = vsyncpa [#allocation10 + $0x1], 0  ;;  %s1940_s21 = smov 0   ;;  %s1942_s22 = smov 0  }
  0x10   :  { %s1944_s23 = smov 0   ;;  %s1946_s24 = smov 0  }
  0x11   :  { %s1948_s25 = smov 0   ;;  %s1950_s26 = smov 0  }
  0x12   :  { %s1952_s27 = smov 0   ;;  %s1954_s28 = smov 0  }
  0x13   :  { %s1956_s29 = smov 0   ;;  %s1958_s30 = smov 0  }
  0x14   :  { %s1960_s7 = smov 0   ;;  %s1962_s8 = smov 0  }
  0x15   :  { %s1964_s9 = smov 0   ;;  %s1966_s10 = smov 0  }
  0x16   :  { %s1968_s11 = smov 0   ;;  %s1970_s12 = smov 0  }
  0x17   :  { %s1972_s13 = smov 0  }
  0x18 LB: > { %2553 = sst [smem:[#allocation16_spill]] %s1842_s24  ;;  %s2024_s14 = sadd.s32 4294967295, %s1894_s13   ;;  %s1894_s13 = sphi %s1972_s13, %s29_s13   ;;  %s1890_s12 = sphi %s1970_s12, %s2610_s12   ;;  %s1886_s11 = sphi %s1968_s11, %s2619_s11   ;;  %s1882_s10 = sphi %s1966_s10, %s2608_s10   ;;  %s1878_s9 = sphi %s1964_s9, %s2607_s9   ;;  %s1874_s8 = sphi %s1962_s8, %s2606_s8   ;;  %s1870_s7 = sphi %s1960_s7, %s2618_s7   ;;  %s1866_s30 = sphi %s1958_s30, %s2617_s30   ;;  %s1862_s29 = sphi %s1956_s29, %s2604_s29   ;;  %s1858_s28 = sphi %s1954_s28, %s2603_s28   ;;  %s1854_s27 = sphi %s1952_s27, %s2602_s27   ;;  %s1850_s26 = sphi %s1950_s26, %s2616_s26   ;;  %s1846_s25 = sphi %s1948_s25, %s2615_s25   ;;  %s1842_s24 = sphi %s1946_s24, %s2614_s24   ;;  %s1838_s23 = sphi %s1944_s23, %s2613_s23   ;;  %s1834_s22 = sphi %s1942_s22, %s2612_s22   ;;  %s1830_s21 = sphi %s1940_s21, %s2611_s21  }
  0x19   : > { %2554 = sst [smem:[#allocation17_spill]] %s1858_s28  ;;  %s38_s16 = sadd.s32 1, %s1886_s11 }
  0x1a   : > { %2555 = sst [smem:[#allocation18_spill]] %s1862_s29  ;;  %s41_s17 = sadd.s32 1, %s1890_s12 }
  0x1b   : > { %2556 = sst [smem:[#allocation19_spill]] %s1874_s8  ;;  %p39_p0 = scmp.ge.s32.totalorder %s38_s16, 4 }
  0x1c   : > { %2557 = sst [smem:[#allocation20_spill]] %s1878_s9  ;;  %s45_s18 = smul.u32 6, %s1890_s12 }
  0x1d   : > { %2558 = sst [smem:[#allocation21_spill]] %s1882_s10  ;;  %p2539_p1 = scmp.eq.s32.totalorder %s1894_s13, 0 }
  0x1e   : > { %2559 = sst [smem:[#allocation22_spill]] %s1886_s11  ;;  %p2537_p2 = scmp.eq.s32.totalorder %s2024_s14, 0 }
  0x1f   : > { %2560 = sst [smem:[#allocation23_spill]] %s1890_s12  ;;  %s2621_s16 = smov (%p39_p0, %s38_s16), 0 }
  0x20   : > { %2561 = sst [smem:[#allocation24_spill]] %s2621_s16  ;;  %s2623_s17 = smov (!%p39_p0, %s41_s17), %s1890_s12 }
  0x21   : > { %s2036_s19 = sadd.s32 %s1886_s11, %s45_s18  ;;  %s84_s20 = sadd.s32 1, %s1862_s29 }
  0x22   : > { %p43_p3 = scmp.ge.s32.totalorder %s2623_s17, 2  ;;  %s77_s15 = sadd.s32 1, %s2036_s19 }
  0x23   : > { %p91_p4 = scmp.ne.s32.totalorder %s1862_s29, %s1858_s28  ;;  %p97_p5 = scmp.ne.s32.totalorder %s1858_s28, %s1854_s27 }
  0x24   : > { %s2625_s17 = smov (%p43_p3, %s2623_s17), 0  ;;  %s109_s4 = sadd.s32 2, %s2036_s19 }
  0x25   : > { %2562 = sst [smem:[#allocation25_spill]] %s2625_s17  ;;  %p2047_p6 = por %p91_p4, %p2539_p1 }
  0x26   : > { %p2053_p7 = por %p97_p5, %p2537_p2  ;;  %s47_s5 = smul.u32 6, %s2625_s17 }
  0x27   : > { %s1168_s9 = sshll.u32 %s1890_s12, 2  ;;  %s1169_s27 = sshll.u32 %s2625_s17, 2 }
  0x28   : > { %s2564_s18 = scalar_select %p2053_p7, 1, 0 }
  0x29   : > { %s48_s10 = sadd.s32 %s47_s5, %s2621_s16  ;;  %s191_s3 = sadd.s32 %s1886_s11, %s1168_s9 }
  0x2a   : > { %2565 = sst [smem:[#allocation26_spill]] %s2564_s18  ;;  %s49_s28 = ssub.s32 %s2036_s19, %s48_s10 }
  0x2b   : > { %s80_s2 = sadd.s32 1, %s48_s10  ;;  %p2064_p8 = scmp.eq.s32.totalorder %s49_s28, 0 }
  0x2c   : > { %s81_s18 = ssub.s32 %s77_s15, %s80_s2  ;;  %s112_s17 = sadd.s32 2, %s48_s10 }
  0x2d   : > { %p82_p9 = scmp.eq.s32.totalorder %s81_s18, 0  ;;  %s2068_s12 = ssub.s32 %s109_s4, %s112_s17 }
  0x2e   : > { %s193_s5 = sadd.s32 %s1169_s27, %s2621_s16  ;;  %s197_s28 = sadd.s32 1, %s1838_s23 }
  0x2f   : > { %s2072_s9 = scalar_select %p82_p9, %s1862_s29, %s84_s20  }
  0x30   : > { %s194_s11 = ssub.s32 %s191_s3, %s193_s5  ;;  %p207_p12 = scmp.ne.s32.totalorder %s1838_s23, %s1834_s22 }
  0x31   : > { %2567 = sst [smem:[#allocation27_spill]] %s2072_s9  ;;  %p195_p11 = scmp.eq.s32.totalorder %s194_s11, 0 }
  0x32   : > { %p208_p13 = scmp.eq.s32.totalorder %s2024_s14, 7  ;;  %p213_p3 = scmp.ne.s32.totalorder %s1834_s22, %s1830_s21 }
  0x33   : > { %s2080_s2 = scalar_select %p195_p11, %s1838_s23, %s197_s28  }
  0x34   : > { %p2082_p0 = por %p208_p13, %p207_p12  ;;  %s2569_s10 = sadd.s32 4294967294, %s1894_s13  }
  0x35   : > { %p214_p4 = scmp.eq.s32.totalorder %s2569_s10, 7  ;;  %p2538_p5 = scmp.lt.s32.totalorder %s1894_s13, 8 }
  0x36   : > { %s2092_s15 = smul.u32 320, %s2036_s19  ;;  %s290_s11 = sand.u32 1, %s1894_s13  }
  0x37   : > { %p2094_p9 = por %p214_p4, %p213_p3  ;;  %s292_s17 = sand.u32 1, %s1862_s29  }
  0x38   : > { %s1394_s20 = smul.u32 20, %s292_s17  ;;  %s2571_s1 = sld [smem:[#allocation30_spill]] }
  0x39   : > { %s2570_s3 = scalar_select %p2094_p9, 1, 0 }
  0x3a   : > { %p2108_p11 = pnand %p2538_p5, %p2047_p6  ;;  %s294_s19 = scalar_lea.vmem [#allocation5], %s1394_s20 }
  0x3b   : > { %s304_s16 = sshll.u32 %s294_s19, 4  ;;  %p336_p13 = scmp.lt.s32.totalorder %s1894_s13, 9  ;;  %s305_s16 = int_to_ptr.vmem [resolvable:$true] %s304_s16 }
  0x3c   : > { %s2114_s9 = scalar_lea.sflag [#allocation6], %s290_s11  ;;  %p1604_p3 = pneg %p2108_p11 }
  0x3d   : > { %s1615_s17 = scalar_lea.vmem %s305_s16, 320  ;;  %s1896_s6 = smov [#allocation5]  }
  0x3e   : > { %s1037_s5 = scalar_lea.hbm %s2571_s1, %s2092_s15  ;;  %p1616_p4 = scmp.ne.s32.totalorder %s305_s16, %s1615_s17 }
  0x3f   : > { %s1038_s28 = scalar_lea.hbm %s1037_s5, 320  ;;  %s1620_s18 = sshll.u32 %s1896_s6, 4  ;;  %s1621_s18 = int_to_ptr.vmem [resolvable:$false] %s1620_s18 }
  0x40   : > { %p1618_p10 = pnand %p1616_p4, %p1604_p3  ;;  %s1622_s27 = scalar_lea.vmem %s1621_s18, 640 }
  0x41   : > { %p1623_p6 = scmp.lt.s32.totalorder %s305_s16, %s1621_s18  ;;  %p1624_p5 = scmp.lt.s32.totalorder %s1622_s27, %s1615_s17 }
  0x42   : > { %p1619_p2 = pneg %p1618_p10 }
  0x43   : > { %p1625_p1 = por %p1624_p5, %p1623_p6 }
  0x45   : > { %p1626_p12 = pnand %p1625_p1, %p1619_p2 }
  0x47   : > { %1629 = shalt.err (!%p1626_p12)
}
  0x48   : > { %s2540_s20 = smov 64   ;;  %s2542_s11 = smov 4  }
  0x49   : > { %1416 = dma.hbm_to_vmem [thread:$0]  (!%p2108_p11), %s1038_s28, 320, %s305_s16, %s2114_s9, %s2540_s20, %s2540_s20, %s2542_s11  }
  0x4a   : > { %p2573_p1 = scmp.ge.s32.totalorder %s1894_s13, 1  ;;  %s52_s19 = sadd.s32 1, %s1874_s8 }
  0x4b   : > { %s2136_s17 = scalar_select %p2064_p8, %s1874_s8, %s52_s19  }
  0x4c   : > { %p2128_p2 = pnand %p2573_p1, %p336_p13  ;;  %p59_p10 = scmp.ne.s32.totalorder %s1874_s8, %s1870_s7 }
  0x4d   : > { %2575 = sst [smem:[#allocation28_spill]] %s2136_s17  ;;  %p65_p5 = scmp.ne.s32.totalorder %s1870_s7, %s1866_s30 }
  0x4e   : > { %s267_s6 = sand.u32 1, %s1874_s8   ;;  %s2576_s0 = sld [smem:[#allocation29_spill]] }
  0x4f   : > { %p2577_p12 = scmp.eq.s32.totalorder %s1894_s13, 0  ;;  %p2578_p11 = scmp.eq.s32.totalorder %s2024_s14, 0 }
  0x50   : > { %s1392_s28 = smul.u32 20, %s267_s6  ;;  %p2580_p13 = scmp.lt.s32.totalorder %s1894_s13, 8 }
  0x51   : > { %p61_p3 = por %p2577_p12, %p59_p10  ;;  %p2151_p4 = por %p2578_p11, %p65_p5 }
  0x52   : > { %s271_s30 = scalar_lea.vmem [#allocation2], %s1392_s28  ;;  %s268_s20 = scalar_lea.sflag [#allocation3], %s267_s6 }
  0x53   : > { %p2157_p6 = pnand %p2580_p13, %p61_p3  ;;  %s280_s19 = sshll.u32 %s271_s30, 4  ;;  %s281_s19 = int_to_ptr.vmem [resolvable:$true] %s280_s19 }
  0x54   : > { %s279_s10 = scalar_lea.hbm %s2576_s0, %s2092_s15  ;;  %s1644_s18 = scalar_lea.vmem %s281_s19, 320 }
  0x55   : > { %p1633_p8 = pneg %p2157_p6  ;;  %p1645_p1 = scmp.ne.s32.totalorder %s281_s19, %s1644_s18 }
  0x56   : > { %s1899_s27 = smov [#allocation2]  }
  0x57   : > { %p1647_p10 = pnand %p1645_p1, %p1633_p8  ;;  %s1649_s11 = sshll.u32 %s1899_s27, 4  ;;  %s1650_s11 = int_to_ptr.vmem [resolvable:$false] %s1649_s11 }
  0x58   : > { %s1651_s0 = scalar_lea.vmem %s1650_s11, 640  ;;  %p1652_p12 = scmp.lt.s32.totalorder %s281_s19, %s1650_s11 }
  0x59   : > { %p1648_p5 = pneg %p1647_p10  ;;  %p1653_p3 = scmp.lt.s32.totalorder %s1651_s0, %s1644_s18 }
  0x5b   : > { %p1654_p11 = por %p1653_p3, %p1652_p12 }
  0x5d   : > { %p1655_p13 = pnand %p1654_p11, %p1648_p5 }
  0x5f   : > { %1658 = shalt.err (!%p1655_p13)
}
  0x60   : > { %s2582_s28 = smov 4   ;;  %s2583_s30 = smov 64  }
  0x61   : > { %s2584_s6 = sld [smem:[#allocation16_spill]]  ;;  %s116_s0 = sadd.s32 1, %s1850_s26 }
  0x62   : > { %1413 = dma.hbm_to_vmem [thread:$0]  (!%p2157_p6), %s279_s10, 320, %s281_s19, %s268_s20, %s2583_s30, %s2583_s30, %s2582_s28  }
  0x63   : > { %p2585_p8 = scmp.eq.s32.totalorder %s2068_s12, 0  ;;  %p123_p1 = scmp.ne.s32.totalorder %s1850_s26, %s1846_s25 }
  0x64   : > { %s316_s24 = sand.u32 1, %s1850_s26   ;;  %s2586_s1 = sld [smem:[#allocation31_spill]] }
  0x65   : > { %s2172_s11 = scalar_select %p2585_p8, %s1850_s26, %s116_s0  }
  0x66   : > { %p2587_p5 = scmp.eq.s32.totalorder %s1894_s13, 0  ;;  %p2588_p3 = scmp.eq.s32.totalorder %s2024_s14, 0 }
  0x67   : > { %p129_p10 = scmp.ne.s32.totalorder %s1846_s25, %s2584_s6  ;;  %s1395_s29 = smul.u32 20, %s316_s24 }
  0x68   : > { %p125_p12 = por %p123_p1, %p2587_p5  ;;  %p2590_p6 = scmp.lt.s32.totalorder %s1894_s13, 8 }
  0x69   : > { %p2187_p11 = por %p129_p10, %p2588_p3  ;;  %s318_s10 = scalar_lea.vmem [#allocation7], %s1395_s29 }
  0x6a   : > { %s1045_s17 = scalar_lea.hbm %s2586_s1, %s2092_s15  ;;  %p2193_p13 = pnand %p2590_p6, %p125_p12 }
  0x6b   : > { %s1046_s20 = scalar_lea.hbm %s1045_s17, 640  ;;  %s328_s19 = sshll.u32 %s318_s10, 4  ;;  %s329_s19 = int_to_ptr.vmem [resolvable:$true] %s328_s19 }
  0x6c   : > { %p1661_p8 = pneg %p2193_p13  ;;  %s1672_s1 = scalar_lea.vmem %s329_s19, 320 }
  0x6d   : > { %p1673_p1 = scmp.ne.s32.totalorder %s329_s19, %s1672_s1  ;;  %s1900_s15 = smov [#allocation7]  }
  0x6e   : > { %s1677_s6 = sshll.u32 %s1900_s15, 4  ;;  %s1678_s6 = int_to_ptr.vmem [resolvable:$false] %s1677_s6 }
  0x6f   : > { %p1675_p5 = pnand %p1673_p1, %p1661_p8  ;;  %s1679_s0 = scalar_lea.vmem %s1678_s6, 640 }
  0x70   : > { %p1680_p3 = scmp.lt.s32.totalorder %s329_s19, %s1678_s6  ;;  %p1681_p12 = scmp.lt.s32.totalorder %s1679_s0, %s1672_s1 }
  0x71   : > { %p1676_p10 = pneg %p1675_p5 }
  0x72   : > { %p1682_p6 = por %p1681_p12, %p1680_p3 }
  0x74   : > { %p1683_p9 = pnand %p1682_p6, %p1676_p10 }
  0x76   : > { %1686 = shalt.err (!%p1683_p9)
}
  0x77   : > { %1419 = dma.hbm_to_vmem [thread:$0]  (!%p2193_p13), %s1046_s20, 320, %s329_s19, %s2114_s9, %s2583_s30, %s2583_s30, %s2582_s28  }
  0x78   : > { %340 = sbr.rel (%p2128_p2) target bundleno = 467 (0x1d3), region = 36  ;;  %s342_s29 = sand.u32 (!%p2128_p2), 1, %s1870_s7  }
  0x79   : > { %s1396_s17 = smul.u32 (!%p2128_p2), 20, %s342_s29  ;;  %s343_s24 = scalar_lea.sflag (!%p2128_p2), [#allocation3], %s342_s29 }
  0x7b   : > { %s2208_s18 = scalar_lea.vmem (!%p2128_p2), [#allocation2], %s1396_s17 }
  0x7d   : > { %1809 = dma.done.wait (%p2151_p4), %s343_s24, 320  }
  0x7e   : > { %1811 = vsyncadd (%p2151_p4), %s343_s24, 4294966976  ;;  %s2592_s27 = sld [smem:[#allocation17_spill]]  ;;  %s351_s10 = sand.u32 1, %s2024_s14  }
  0x7f   : > { %s352_s5 = scalar_lea.sflag [#allocation6], %s351_s10 }
  0x84   : > { %s353_s9 = sand.u32 1, %s2592_s27  }
  0x85   : > { %s1397_s28 = smul.u32 20, %s353_s9 }
  0x87   : > { %s2216_s30 = scalar_lea.vmem [#allocation5], %s1397_s28 }
  0x88   : > { %1813 = dma.done.wait (%p2053_p7), %s352_s5, 320  }
  0x89   : > { %1815 = vsyncadd (%p2053_p7), %s352_s5, 4294966976  ;;  %s362_s20 = sand.u32 1, %s1846_s25  }
  0x8a   : > { %s1398_s19 = smul.u32 20, %s362_s20 }
  0x8c   : > { %s2223_s16 = scalar_lea.vmem [#allocation7], %s1398_s19 }
  0x8d   : > { %1817 = dma.done.wait (%p2187_p11), %s352_s5, 320  }
  0x8e   : > { %1819 = vsyncadd (%p2187_p11), %s352_s5, 4294966976  ;;  %v1901_v0 = vmov 0.0   ;;  %vm1902_vm0 = vmmov 0   ;;  %s2594_s15 = sld [smem:[#allocation32_spill]]  ;;  %v1585_v17 = vld [vmem:[%s2216_s30] sm:$0xff]   ;;  %v1586_v18 = vld [vmem:[%s2208_s18] sm:$0xff]  }
  0x8f   : > { %1292 = vmatprep.subr.bf16.mxu0 %v1901_v0  ;;  %1320 = vmatprep.subr.bf16.mxu1 %v1901_v0  ;;  %v1590_v21 = vld [vmem:[%s2216_s30 + $0x8] sm:$0xff]   ;;  %v1591_v23 = vld [vmem:[%s2208_s18 + $0x8] sm:$0xff]   ;;  %v1594_v25 = vld [vmem:[%s2216_s30 + $0x10] ss:$0 sps:$4 sm:$0xff]   ;;  %s2595_s20 = sld [smem:[#allocation21_spill]]  ;;  %vm886_vm1 = vcmask 60416  }
  0x90   : > { %1308 = vmatprep.mubr.msk.bf16.mxu0 %vm1902_vm0, %v1901_v0  ;;  %1336 = vmatprep.mubr.msk.bf16.mxu1 %vm1902_vm0, %v1901_v0  ;;  %v1595_v27 = vld [vmem:[%s2208_s18 + $0x10] ss:$0 sps:$4 sm:$0xff]   ;;  %v1600_v32 = vld [vmem:[%s2223_s16 + $0x8] sm:$0xff]   ;;  %v1601_v33 = vld [vmem:[%s2223_s16 + $0x10] ss:$0 sps:$4 sm:$0xff]   ;;  %s2596_s19 = sld [smem:[#allocation20_spill]] }
  0x91   : > { %v1599_v31 = vld [vmem:[%s2223_s16] sm:$0xff]   ;;  %s2597_s29 = sld [smem:[#allocation33_spill]]  ;;  %vm892_vm2 = vcmask 64512   ;;  %s2392_s24 = sand.u32 1, %s1834_s22   ;;  %vm908_vm3 = vcmask 57344  }
  0x92   : > { %s406_s12 = scalar_lea.vmem [#allocation8], %s2392_s24  ;;  %s412_s9 = scalar_lea.vmem [#allocation9], %s2392_s24 }
  0x93   : > { %s962_s10 = sshll.u32 %s406_s12, 4  ;;  %s977_s18 = sshll.u32 %s412_s9, 4  ;;  %s2404_s10 = int_to_ptr.vmem [resolvable:$true] %s962_s10  ;;  %s2412_s18 = int_to_ptr.vmem [resolvable:$true] %s977_s18 }
  0x94   : > { %v1569_v1 = vld [vmem:[%s2594_s15 + $0x78] sm:$0xff]   ;;  %v1571_v3 = vld [vmem:[%s2594_s15 + $0x70] sm:$0xff]   ;;  %v1573_v5 = vld [vmem:[%s2594_s15 + $0x68] sm:$0xff]   ;;  %s2598_s5 = sld [smem:[#allocation34_spill]]  ;;  %s1688_s0 = scalar_lea.vmem %s2404_s10, 16 }
  0x95   : > { %v1570_v2 = vld [vmem:[%s2594_s15 + $0x38] sm:$0xff]   ;;  %1293 = vmatpush3.bf16.msra.mxu0 %v1569_v1  ;;  %v1572_v4 = vld [vmem:[%s2594_s15 + $0x30] sm:$0xff]   ;;  %v1574_v6 = vld [vmem:[%s2594_s15 + $0x28] sm:$0xff]   ;;  %s1176_s16 = sshll.u32 %s2595_s20, 2  ;;  %p1689_p9 = scmp.ne.s32.totalorder %s2404_s10, %s1688_s0 }
  0x96   : > { %1321 = vmatpush3.bf16.msra.mxu1 %v1570_v2  ;;  %1294 = vmatprep.subr.bf16.mxu0 %v1901_v0  ;;  %v1575_v7 = vld [vmem:[%s2594_s15 + $0x60] sm:$0xff]   ;;  %v1577_v9 = vld [vmem:[%s2594_s15 + $0x58] sm:$0xff]   ;;  %v1579_v11 = vld [vmem:[%s2594_s15 + $0x50] sm:$0xff]   ;;  %s2362_s14 = sadd.s32 %s2596_s19, %s1176_s16  ;;  %s1903_s8 = smov [#allocation8]  }
  0x97   : > { %1322 = vmatprep.subr.bf16.mxu1 %v1901_v0  ;;  %v1576_v8 = vld [vmem:[%s2594_s15 + $0x20] sm:$0xff]   ;;  %v1578_v10 = vld [vmem:[%s2594_s15 + $0x18] sm:$0xff]   ;;  %v1580_v12 = vld [vmem:[%s2594_s15 + $0x10] sm:$0xff]   ;;  %p423_p7 = scmp.lt.s32.totalorder %s2362_s14, 7  ;;  %s1249_s27 = sshll.u32 %s2362_s14, 4 }
  0x98   : > { %v1581_v13 = vld [vmem:[%s2594_s15 + $0x48] sm:$0xff]   ;;  %v1583_v15 = vld [vmem:[%s2594_s15 + $0x40] sm:$0xff]   ;;  %v1587_v19 = vld [vmem:[%s2594_s15 + $0xb8] sm:$0xff]   ;;  %p1690_p2 = pnand %p1689_p9, %p2082_p0 }
  0x99   : > { %1295 = vmatpush3.bf16.msra.mxu0 %v1571_v3  ;;  %v1582_v14 = vld [vmem:[%s2594_s15 + $0x8] sm:$0xff]   ;;  %v1584_v16 = vld [vmem:[%s2594_s15] sm:$0xff]   ;;  %v1588_v20 = vld [vmem:[%s2594_s15 + $0xb0] sm:$0xff]   ;;  %s424_s1 = scalar_select %p423_p7, %s2362_s14, 7 }
  0x9a   : > { %1323 = vmatpush3.bf16.msra.mxu1 %v1572_v4  ;;  %1296 = vmatprep.subr.bf16.mxu0 %v1901_v0  ;;  %v1589_v22 = vld [vmem:[%s2594_s15 + $0xa8] sm:$0xff]   ;;  %v1592_v24 = vld [vmem:[%s2594_s15 + $0xa0] sm:$0xff]   ;;  %v1593_v26 = vld [vmem:[%s2594_s15 + $0x98] sm:$0xff]   ;;  %s2402_s20 = scalar_lea.hbm %s2598_s5, %s1249_s27  ;;  %s2599_s14 = sld [smem:[#allocation35_spill]] }
  0x9b   : > { %1324 = vmatprep.subr.bf16.mxu1 %v1901_v0  ;;  %v1596_v28 = vld [vmem:[%s2594_s15 + $0x90] sm:$0xff]   ;;  %v1597_v29 = vld [vmem:[%s2594_s15 + $0x88] sm:$0xff]   ;;  %v1598_v30 = vld [vmem:[%s2594_s15 + $0x80] sm:$0xff]   ;;  %s1399_s6 = smul.u32 20, %s424_s1  ;;  %p1691_p4 = pneg %p1690_p2 }
  0x9d   : > { %1297 = vmatpush3.bf16.msra.mxu0 %v1573_v5  ;;  %s2369_s17 = scalar_lea.vmem %s2597_s29, %s1399_s6  ;;  %s939_s6 = scalar_lea.sflag [#allocation4], %s2392_s24 }
  0x9e   : > { %1325 = vmatpush3.bf16.msra.mxu1 %v1574_v6  ;;  %1298 = vmatprep.subr.bf16.mxu0 %v1901_v0  ;;  %s1692_s29 = sshll.u32 %s1903_s8, 4  ;;  %s1693_s29 = int_to_ptr.vmem [resolvable:$false] %s1692_s29 }
  0x9f   : > { %1326 = vmatprep.subr.bf16.mxu1 %v1901_v0  ;;  %p1695_p11 = scmp.lt.s32.totalorder %s2404_s10, %s1693_s29 }
  0xa0   : > { %s2410_s1 = scalar_lea.hbm %s2599_s14, %s1249_s27 }
  0xa1   : > { %1299 = vmatpush3.bf16.msra.mxu0 %v1575_v7 }
  0xa2   : > { %1327 = vmatpush3.bf16.msra.mxu1 %v1576_v8  ;;  %1300 = vmatprep.subr.bf16.mxu0 %v1901_v0 }
  0xa3   : > { %1328 = vmatprep.subr.bf16.mxu1 %v1901_v0 }
  0xa5   : > { %1301 = vmatpush3.bf16.msra.mxu0 %v1577_v9 }
  0xa6   : > { %1329 = vmatpush3.bf16.msra.mxu1 %v1578_v10  ;;  %1302 = vmatprep.subr.bf16.mxu0 %v1901_v0 }
  0xa7   : > { %1330 = vmatprep.subr.bf16.mxu1 %v1901_v0 }
  0xa9   : > { %1303 = vmatpush3.bf16.msra.mxu0 %v1579_v11 }
  0xaa   : > { %1331 = vmatpush3.bf16.msra.mxu1 %v1580_v12  ;;  %1304 = vmatprep.subr.bf16.mxu0 %v1901_v0 }
  0xab   : > { %1332 = vmatprep.subr.bf16.mxu1 %v1901_v0 }
  0xad   : > { %1305 = vmatpush3.bf16.msra.mxu0 %v1581_v13 }
  0xae   : > { %1333 = vmatpush3.bf16.msra.mxu1 %v1582_v14  ;;  %1306 = vmatprep.subr.bf16.mxu0 %v1901_v0 }
  0xaf   : > { %1334 = vmatprep.subr.bf16.mxu1 %v1901_v0 }
  0xb1   : > { %1307 = vmatpush3.bf16.msra.mxu0 %v1583_v15 }
  0xb2   : > { %1335 = vmatpush3.bf16.msra.mxu1 %v1584_v16  ;;  %1348 = vmatprep.subr.bf16.mxu0 %v1901_v0 }
  0xb3   : > { %1376 = vmatprep.subr.bf16.mxu1 %v1901_v0 }
  0xb4   : > { %1309 = vmatmul.mubr.bf16.vlgmr.msra.gmra.mxu0 %v1585_v17 }
  0xb5   : > { %1337 = vmatmul.mubr.bf16.vlgmr.msra.gmra.mxu1 %v1586_v18  ;;  %1349 = vmatpush3.bf16.msra.mxu0 %v1587_v19 }
  0xb6   : > { %1384 = vmatpush3.bf16.msra.mxu1 %v1587_v19  ;;  %1350 = vmatprep.subr.bf16.mxu0 %v1901_v0 }
  0xb7   : > { %1377 = vmatprep.subr.bf16.mxu1 %v1901_v0  ;;  %1312 = vmatprep.mubr.msk.bf16.mxu0 %vm1902_vm0, %v1901_v0 }
  0xb8   : > { %1340 = vmatprep.mubr.msk.bf16.mxu1 %vm1902_vm0, %v1901_v0 }
  0xb9   : > { %1351 = vmatpush3.bf16.msra.mxu0 %v1588_v20 }
  0xba   : > { %1385 = vmatpush3.bf16.msra.mxu1 %v1588_v20  ;;  %1352 = vmatprep.subr.bf16.mxu0 %v1901_v0 }
  0xbb   : > { %1378 = vmatprep.subr.bf16.mxu1 %v1901_v0 }
  0xbc   : > { %1313 = vmatmul.mubr.bf16.gmra.mxu0 %v1590_v21 }
  0xbd   : > { %1353 = vmatpush3.bf16.msra.mxu0 %v1589_v22  ;;  %1341 = vmatmul.mubr.bf16.gmra.mxu1 %v1591_v23 }
  0xbe   : > { %1386 = vmatpush3.bf16.msra.mxu1 %v1589_v22  ;;  %1354 = vmatprep.subr.bf16.mxu0 %v1901_v0 }
  0xbf   : > { %1379 = vmatprep.subr.bf16.mxu1 %v1901_v0  ;;  %1316 = vmatprep.mubr.msk.bf16.mxu0 %vm1902_vm0, %v1901_v0 }
  0xc0   : > { %1344 = vmatprep.mubr.msk.bf16.mxu1 %vm1902_vm0, %v1901_v0 }
  0xc1   : > { %1355 = vmatpush3.bf16.msra.mxu0 %v1592_v24 }
  0xc2   : > { %1387 = vmatpush3.bf16.msra.mxu1 %v1592_v24  ;;  %1356 = vmatprep.subr.bf16.mxu0 %v1901_v0 }
  0xc3   : > { %1380 = vmatprep.subr.bf16.mxu1 %v1901_v0 }
  0xc4   : > { %1317 = vmatmul.mubr.bf16.gmra.mxu0 %v1594_v25 }
  0xc5   : > { %1357 = vmatpush3.bf16.msra.mxu0 %v1593_v26  ;;  %1345 = vmatmul.mubr.bf16.gmra.mxu1 %v1595_v27 }
  0xc6   : > { %1388 = vmatpush3.bf16.msra.mxu1 %v1593_v26  ;;  %1358 = vmatprep.subr.bf16.mxu0 %v1901_v0 }
  0xc7   : > { %1381 = vmatprep.subr.bf16.mxu1 %v1901_v0  ;;  %1364 = vmatprep.mubr.msk.bf16.mxu0 %vm1902_vm0, %v1901_v0 }
  0xc8   : > { %1368 = vmatprep.mubr.msk.bf16.mxu1 %vm1902_vm0, %v1901_v0 }
  0xc9   : > { %1359 = vmatpush3.bf16.msra.mxu0 %v1596_v28 }
  0xca   : > { %1389 = vmatpush3.bf16.msra.mxu1 %v1596_v28  ;;  %1360 = vmatprep.subr.bf16.mxu0 %v1901_v0 }
  0xcb   : > { %1382 = vmatprep.subr.bf16.mxu1 %v1901_v0 }
  0xcd   : > { %1361 = vmatpush3.bf16.msra.mxu0 %v1597_v29 }
  0xce   : > { %1390 = vmatpush3.bf16.msra.mxu1 %v1597_v29  ;;  %1362 = vmatprep.subr.bf16.mxu0 %v1901_v0 }
  0xcf   : > { %1383 = vmatprep.subr.bf16.mxu1 %v1901_v0 }
  0xd1   : > { %1363 = vmatpush3.bf16.msra.mxu0 %v1598_v30 }
  0xd2   : > { %1391 = vmatpush3.bf16.msra.mxu1 %v1598_v30 }
  0xd4   : > { %1365 = vmatmul.mubr.bf16.vlgmr.msra.gmra.mxu0 %v1599_v31 }
  0xd5   : > { %1369 = vmatmul.mubr.bf16.vlgmr.msra.gmra.mxu1 %v1600_v32 }
  0xd6   : > { %1372 = vmatprep.mubr.msk.bf16.mxu1 %vm1902_vm0, %v1901_v0 }
  0xdd   : > { %1373 = vmatmul.mubr.bf16.gmra.mxu1 %v1601_v33 }
 0x174   : > { %v576_v34 = vpop.f32.mrf.mxu0 }
 0x175   : > { %v696_v35 = vpop.f32.mrf.mxu1 }
 0x176   : > { %v1310_v36 = vpop.f32.mrf.mxu0  ;;  %v697_v58 = vadd.f32 %v696_v35, %v576_v34 }
 0x177   : > { %v1338_v37 = vpop.f32.mrf.mxu1 }
 0x178   : > { %v579_v38 = vpop.f32.mrf.mxu0 }
 0x179   : > { %v699_v39 = vpop.f32.mrf.mxu1 }
 0x17a   : > { %v1311_v40 = vpop.f32.mrf.mxu0  ;;  %v700_v1 = vadd.f32 %v699_v39, %v579_v38 }
 0x17b   : > { %v1339_v41 = vpop.f32.mrf.mxu1 }
 0x17c   : > { %v584_v42 = vpop.f32.mrf.mxu0 }
 0x17d   : > { %v704_v43 = vpop.f32.mrf.mxu1 }
 0x17e   : > { %v1314_v44 = vpop.f32.mrf.mxu0  ;;  %v705_v59 = vadd.f32 %v704_v43, %v584_v42 }
 0x17f   : > { %v1342_v45 = vpop.f32.mrf.mxu1 }
 0x180   : > { %v587_v46 = vpop.f32.mrf.mxu0 }
 0x181   : > { %v707_v47 = vpop.f32.mrf.mxu1 }
 0x182   : > { %v1315_v48 = vpop.f32.mrf.mxu0  ;;  %v708_v4 = vadd.f32 %v707_v47, %v587_v46 }
 0x183   : > { %v1343_v49 = vpop.f32.mrf.mxu1 }
 0x184   : > { %v592_v50 = vpop.f32.mrf.mxu0 }
 0x185   : > { %v712_v51 = vpop.f32.mrf.mxu1 }
 0x186   : > { %v1318_v52 = vpop.f32.mrf.mxu0  ;;  %v713_v18 = vadd.f32 %v712_v51, %v592_v50 }
 0x187   : > { %v1346_v53 = vpop.f32.mrf.mxu1 }
 0x188   : > { %v595_v54 = vpop.f32.mrf.mxu0 }
 0x189   : > { %v715_v55 = vpop.f32.mrf.mxu1 }
 0x18a   : > { %v1319_v56 = vpop.f32.mrf.mxu0 }
 0x18b   : > { %v1347_v57 = vpop.f32.mrf.mxu1 }
 0x194   : > { %v838_v60 = vpop.f32.mrf.mxu0 }
 0x195   : > { %v860_v61 = vadd.f32 %v838_v60, %v697_v58  ;;  %v846_v62 = vpop.f32.mrf.mxu1 }
 0x196   : > { %v862_v63 = vadd.f32 %v846_v62, %v705_v59  ;;  %v1366_v0 = vpop.f32.mrf.mxu0 }
 0x197   : > { %v1254_v2 = vpack.c.bf16 %v860_v61, %v860_v61  ;;  %v1370_v3 = vpop.f32.mrf.mxu1  ;;  %v910_v7 = vmul.f32 %v860_v61, %v860_v61  ;;  %v893_v10 = vsel %vm892_vm2, %v860_v61, 0.0 }
 0x198   : > { %v1256_v5 = vpack.c.bf16 %v862_v63, %v862_v63  ;;  %v841_v6 = vpop.f32.mrf.mxu0  ;;  %v912_v13 = vmul.f32 %v862_v63, %v862_v63  ;;  %v896_v22 = vsel %vm892_vm2, %v862_v63, 0.0 }
 0x199   : > { %v861_v8 = vadd.f32 %v841_v6, %v700_v1  ;;  %v849_v9 = vpop.f32.mrf.mxu1  ;;  %887 = vst.msk [vmem:[%s2369_s17] sm:$0xf] %vm886_vm1, %v1254_v2  ;;  %v915_v21 = vsel %vm892_vm2, %v910_v7, 0.0 }
 0x19a   : > { %v863_v11 = vadd.f32 %v849_v9, %v708_v4  ;;  %v1367_v12 = vpop.f32.mrf.mxu0  ;;  %889 = vst.msk [vmem:[%s2369_s17 + $0x8] sm:$0xf] %vm886_vm1, %v1256_v5  ;;  %v918_v29 = vsel %vm892_vm2, %v912_v13, 0.0 }
 0x19b   : > { %v1255_v14 = vpack.c.bf16 %v861_v8, %v861_v8  ;;  %v894_v15 = vsel %vm892_vm2, %v861_v8, 0.0  ;;  %v911_v16 = vmul.f32 %v861_v8, %v861_v8  ;;  %v1371_v17 = vpop.f32.mrf.mxu1 }
 0x19c   : > { %v895_v19 = vadd.f32 %v894_v15, %v893_v10  ;;  %v1257_v20 = vpack.c.bf16 %v863_v11, %v863_v11  ;;  %v913_v24 = vmul.f32 %v863_v11, %v863_v11  ;;  %v898_v30 = vsel %vm892_vm2, %v863_v11, 0.0 }
 0x19d   : > { %v916_v23 = vsel %vm892_vm2, %v911_v16, 0.0  ;;  %v854_v25 = vpop.f32.mrf.mxu1  ;;  %888 = vst.msk [vmem:[%s2369_s17 + $0x4] sm:$0xf] %vm886_vm1, %v1255_v14 }
 0x19e   : > { %v917_v26 = vadd.f32 %v916_v23, %v915_v21  ;;  %v897_v27 = vadd.f32 %v896_v22, %v895_v19  ;;  %v864_v28 = vadd.f32 %v854_v25, %v713_v18  ;;  %890 = vst.msk [vmem:[%s2369_s17 + $0xc] sm:$0xf] %vm886_vm1, %v1257_v20  ;;  %v920_v35 = vsel %vm892_vm2, %v913_v24, 0.0 }
 0x19f   : > { %v1374_v31 = vpop.f32.mrf.mxu1 }
 0x1a0   : > { %v899_v32 = vadd.f32 %v898_v30, %v897_v27  ;;  %v919_v33 = vadd.f32 %v918_v29, %v917_v26  ;;  %v1258_v34 = vpack.c.bf16 %v864_v28, %v864_v28  ;;  %v900_v36 = vsel %vm892_vm2, %v864_v28, 0.0 }
 0x1a1   : > { %v914_v37 = vmul.f32 %v864_v28, %v864_v28  ;;  %v857_v38 = vpop.f32.mrf.mxu1 }
 0x1a2   : > { %v921_v39 = vadd.f32 %v920_v35, %v919_v33  ;;  %v901_v40 = vadd.f32 %v900_v36, %v899_v32  ;;  %891 = vst.msk [vmem:[%s2369_s17 + $0x10] sm:$0xf] %vm886_vm1, %v1258_v34  ;;  %s1694_s17 = scalar_lea.vmem %s1693_s29, 32 }
 0x1a3   : > { %v922_v41 = vsel %vm892_vm2, %v914_v37, 0.0  ;;  %v1375_v42 = vpop.f32.mrf.mxu1  ;;  %p1696_p13 = scmp.lt.s32.totalorder %s1694_s17, %s1688_s0 }
 0x1a4   : > { %v902_v43 = vrot.slane %v901_v40, 4  ;;  %v923_v44 = vadd.f32 %v922_v41, %v921_v39 }
 0x1a5   : > { %p1697_p8 = por %p1696_p13, %p1695_p11 }
 0x1a6   : > { %v903_v45 = vadd.f32 %v902_v43, %v901_v40  ;;  %v924_v46 = vrot.slane %v923_v44, 4 }
 0x1a7   : > { %p1698_p1 = pnand %p1697_p8, %p1691_p4 }
 0x1a8   : > { %v904_v47 = vrot.slane %v903_v45, 2  ;;  %v925_v48 = vadd.f32 %v924_v46, %v923_v44 }
 0x1aa   : > { %v905_v49 = vadd.f32 %v904_v47, %v903_v45  ;;  %v926_v50 = vrot.slane %v925_v48, 2 }
 0x1ac   : > { %v906_v51 = vrot.slane %v905_v49, 1  ;;  %v927_v52 = vadd.f32 %v926_v50, %v925_v48 }
 0x1ae   : > { %v907_v53 = vadd.f32 %v906_v51, %v905_v49  ;;  %v928_v54 = vrot.slane %v927_v52, 1 }
 0x1b0   : > { %909 = vst.msk [vmem:[%s406_s12] sm:$0x1] %vm908_vm3, %v907_v53  ;;  %v929_v55 = vadd.f32 %v928_v54, %v927_v52 }
 0x1b1   : > { %1701 = shalt.err (!%p1698_p1)
}
 0x1b2   : > { %s1702_s27 = scalar_lea.hbm %s2402_s20, 16  ;;  %s1706_s28 = scalar_lea.hbm %s2598_s5, 128 }
 0x1b3   : > { %p1703_p5 = scmp.ne.s32.totalorder %s2402_s20, %s1702_s27  ;;  %p1707_p12 = scmp.lt.s32.totalorder %s2402_s20, %s2598_s5 }
 0x1b4   : > { %p1708_p6 = scmp.lt.s32.totalorder %s1706_s28, %s1702_s27 }
 0x1b5   : > { %p1704_p10 = pnand %p1703_p5, %p2082_p0 }
 0x1b6   : > { %p1709_p7 = por %p1708_p6, %p1707_p12 }
 0x1b7   : > { %p1705_p3 = pneg %p1704_p10 }
 0x1b9   : > { %p1710_p9 = pnand %p1709_p7, %p1705_p3 }
 0x1bb   : > { %1713 = shalt.err (!%p1710_p9)
}
 0x1bc   : > { %1406 = dma.vmem_to_hbm [thread:$0]  (%p2082_p0), %s2404_s10, 16, %s2402_s20, %s939_s6   ;;  %930 = vst.msk [vmem:[%s412_s9] sm:$0x1] %vm908_vm3, %v929_v55 }
 0x1bd   : > { %s943_s0 = scalar_lea.sflag [#allocation10], %s2392_s24  ;;  %s1714_s8 = scalar_lea.vmem %s2412_s18, 16 }
 0x1be   : > { %p1715_p2 = scmp.ne.s32.totalorder %s2412_s18, %s1714_s8  ;;  %s1904_s29 = smov [#allocation9]  }
 0x1bf   : > { %s1718_s17 = sshll.u32 %s1904_s29, 4  ;;  %s1719_s17 = int_to_ptr.vmem [resolvable:$false] %s1718_s17 }
 0x1c0   : > { %p1716_p4 = pnand %p1715_p2, %p2082_p0  ;;  %s1720_s27 = scalar_lea.vmem %s1719_s17, 32 }
 0x1c1   : > { %p1721_p13 = scmp.lt.s32.totalorder %s2412_s18, %s1719_s17  ;;  %p1722_p8 = scmp.lt.s32.totalorder %s1720_s27, %s1714_s8 }
 0x1c2   : > { %p1717_p11 = pneg %p1716_p4 }
 0x1c3   : > { %p1723_p1 = por %p1722_p8, %p1721_p13 }
 0x1c5   : > { %p1724_p5 = pnand %p1723_p1, %p1717_p11 }
 0x1c7   : > { %1727 = shalt.err (!%p1724_p5)
}
 0x1c8   : > { %s1728_s10 = scalar_lea.hbm %s2410_s1, 16  ;;  %s1732_s20 = scalar_lea.hbm %s2599_s14, 128 }
 0x1c9   : > { %p1729_p10 = scmp.ne.s32.totalorder %s2410_s1, %s1728_s10  ;;  %p1733_p6 = scmp.lt.s32.totalorder %s2410_s1, %s2599_s14 }
 0x1ca   : > { %p1734_p7 = scmp.lt.s32.totalorder %s1732_s20, %s1728_s10 }
 0x1cb   : > { %p1730_p3 = pnand %p1729_p10, %p2082_p0 }
 0x1cc   : > { %p1735_p9 = por %p1734_p7, %p1733_p6 }
 0x1cd   : > { %p1731_p12 = pneg %p1730_p3 }
 0x1cf   : > { %p1736_p2 = pnand %p1735_p9, %p1731_p12 }
 0x1d1   : > { %1739 = shalt.err (!%p1736_p2)
}
 0x1d2   : > { %1407 = dma.vmem_to_hbm [thread:$0]  (%p2082_p0), %s2412_s18, 16, %s2410_s1, %s943_s0  }
 0x1d3 PF: > { %p1428_p4 = scmp.ge.s32.totalorder %s1894_s13, 2  ;;  %s999_s30 = sand.u32 1, %s1830_s21  }
 0x1d4   : > { %p2600_p11 = scmp.ne.s32.totalorder %s2570_s3, 0  ;;  %s1000_s28 = scalar_lea.sflag [#allocation4], %s999_s30 }
 0x1d6   : > { %p1421_p13 = pnand %p1428_p4, %p2600_p11 }
 0x1d8   : > { %p1422_p8 = pneg %p1421_p13 }
 0x1da   : > { %1821 = dma.done.wait (%p1422_p8), %s1000_s28, 16  }
 0x1db   : > { %1823 = vsyncadd (%p1422_p8), %s1000_s28, 4294967280  ;;  %s1008_s19 = scalar_lea.sflag [#allocation10], %s999_s30 }
 0x1dc   : > { %1825 = dma.done.wait (%p1422_p8), %s1008_s19, 16  }
 0x1dd   : > { %1827 = vsyncadd (%p1422_p8), %s1008_s19, 4294967280  ;;  %s29_s13 = sadd.s32 1, %s1894_s13   ;;  %s2602_s27 = sld [smem:[#allocation17_spill]] }
 0x1de   : > { %p2464_p1 = scmp.ge.s32.totalorder %s29_s13, 10   ;;  %s2603_s28 = sld [smem:[#allocation18_spill]] }
 0x1df   : > { %s2604_s29 = sld [smem:[#allocation27_spill]]  ;;  %s2611_s21 = smov %s1834_s22 }
 0x1e0   : > { %s2605_s3 = sld [smem:[#allocation19_spill]]  ;;  %s2612_s22 = smov %s1838_s23 }
 0x1e1   : > { %s2606_s8 = sld [smem:[#allocation28_spill]]  ;;  %s2613_s23 = smov %s2080_s2 }
 0x1e2   : > { %s2607_s9 = sld [smem:[#allocation22_spill]]  ;;  %s2614_s24 = smov %s1846_s25 }
 0x1e3   : > { %s2608_s10 = sld [smem:[#allocation23_spill]]  ;;  %s2615_s25 = smov %s1850_s26 }
 0x1e4   : > { %s2609_s18 = sld [smem:[#allocation24_spill]]  ;;  %s2616_s26 = smov %s2172_s11 }
 0x1e5   : > { %s2610_s12 = sld [smem:[#allocation25_spill]]  ;;  %s2617_s30 = smov %s1870_s7 }
 0x1e6   : > { %s2618_s7 = smov %s2605_s3  ;;  %28 = sbr.rel (!%p2464_p1) target bundleno = 24 (0x18), region = 136 }
 0x1ea   : > { %s2619_s11 = smov %s2609_s18 }
 0x1eb   :  { %1012 = vsyncpa [#allocation3], 1 }
 0x1ec   :  { %1014 = vsyncpa [#allocation3 + $0x1], 1 }
 0x1ed   :  { %1015 = vsyncpa [#allocation6], 1 }
 0x1ee   :  { %1017 = vsyncpa [#allocation6 + $0x1], 1 }
 0x1ef   :  { %1018 = vsyncpa [#allocation4], 1 }
 0x1f0   :  { %1020 = vsyncpa [#allocation4 + $0x1], 1 }
 0x1f1   :  { %1021 = vsyncpa [#allocation10], 1 }
 0x1f2   :  { %1023 = vsyncpa [#allocation10 + $0x1], 1 }

</bundles_post_ra>
